<compile_context>
chip_gen: v6e
topology: v6e:2x2x1
jax: 0.10.0
libtpu: 0.0.40
codegen_flags: <defaults>
</compile_context>

<pallas_src>
import jax
import jax.numpy as jnp
from jax.experimental import pallas as pl
from jax.experimental.pallas import tpu as pltpu


def _normalize_kernel(mean_ref, scale_ref, img_ref, out_ref):
    # mean_ref / scale_ref: (row_blk, 1) per-row scalars, broadcast along lanes (VPU).
    # img_ref / out_ref:    (row_blk, L) lane-dense tiles.
    # (x - m) * (1/s): two VALU ops, no EUP divide, numerically ~1 ulp from (x - m) / s.
    out_ref[...] = (img_ref[...] - mean_ref[...]) * scale_ref[...]


def normalization_forward(img, mean, std, *, target_block_bytes=4 * 1024 * 1024):
    """(img - mean[:, None, None]) / std[:, None, None] for NCHW img via Pallas."""
    N, C, H, W = img.shape
    dtype = img.dtype
    itemsize = jnp.dtype(dtype).itemsize

    mean = jnp.asarray(mean, dtype=dtype).reshape(C)
    std = jnp.asarray(std, dtype=dtype).reshape(C)
    scale = (1.0 / std).astype(dtype)  # reciprocal precomputed in the wrapper

    R = N * C  # one row per (n, c) plane
    L = H * W  # whole plane laid out along the lane axis (lane-dense stores)

    # Per-row scalars, shape (R, 1), blocked with the same row index_map as the image.
    mean_rows = jnp.tile(mean, N).reshape(R, 1)
    scale_rows = jnp.tile(scale, N).reshape(R, 1)

    img2d = img.reshape(R, L)

    # Large row blocks (~target_block_bytes per buffer) => few grid steps.
    rows_fit = max(1, target_block_bytes // (L * itemsize))
    if rows_fit >= R:
        row_blk = R  # full extent: always satisfies the (8, 128) block rule
    else:
        row_blk = min(R, max(8, (rows_fit // 8) * 8))  # keep a multiple of 8 when tiling
    grid = (pl.cdiv(R, row_blk),)

    # VMEM budget: double-buffered in/out blocks + tiny per-row scalars, with headroom.
    # Stays well under the 32 MiB scoped default / 64 MiB physical VMEM of v7x.
    block_bytes = row_blk * L * itemsize
    vmem_limit = int(min(100 * 2**20, max(32 * 2**20, 5 * block_bytes)))

    out2d = pl.pallas_call(
        _normalize_kernel,
        out_shape=jax.ShapeDtypeStruct((R, L), dtype),
        grid=grid,
        in_specs=[
            pl.BlockSpec((row_blk, 1), lambda i: (i, 0)),  # per-row mean
            pl.BlockSpec((row_blk, 1), lambda i: (i, 0)),  # per-row 1/std
            pl.BlockSpec((row_blk, L), lambda i: (i, 0)),  # image rows (lane-dense)
        ],
        out_specs=pl.BlockSpec((row_blk, L), lambda i: (i, 0)),
        compiler_params=pltpu.CompilerParams(
            dimension_semantics=("parallel",),
            vmem_limit_bytes=vmem_limit,
        ),
    )(mean_rows, scale_rows, img2d)

    return out2d.reshape(N, C, H, W)


if __name__ == "__main__":
    key = jax.random.PRNGKey(0)
    N, C, H, W = 2, 3, 16, 16  # RGB-style normalization, as in the module's typical use

    img = jax.random.uniform(key, (N, C, H, W), dtype=jnp.float32)
    # Deterministic ImageNet-like parameters (module __init__ takes mean/std lists)
    mean = jnp.array([0.485, 0.456, 0.406], dtype=jnp.float32)
    std = jnp.array([0.229, 0.224, 0.225], dtype=jnp.float32)

    out = normalization_forward(img, mean, std)
    out = jax.block_until_ready(out)

    # Reference: plain JAX broadcasting (same semantics as the PyTorch module).
    ref = (img - mean.reshape(-1, 1, 1)) / std.reshape(-1, 1, 1)
    assert out.shape == img.shape
    assert jnp.allclose(out, ref, atol=1e-5, rtol=1e-5)

    print("KERNEL_OK")
</pallas_src>

<mosaic_0001>
module attributes {stable_mosaic.version = 11 : i64} {
  func.func @_normalize_kernel(%arg0: i32, %arg1: memref<6x1xf32, #tpu.memory_space<vmem>>, %arg2: memref<6x1xf32, #tpu.memory_space<vmem>>, %arg3: memref<6x256xf32, #tpu.memory_space<vmem>>, %arg4: memref<6x256xf32, #tpu.memory_space<vmem>>) attributes {dimension_semantics = [#tpu.dimension_semantics<parallel>], iteration_bounds = array<i64: 1>, scalar_prefetch = 0 : i64, scratch_operands = 0 : i64, tpu.core_type = #tpu.core_type<tc>, window_params = [{transform_indices = @transform_0, window_bounds = array<i64: 6, 1>}, {transform_indices = @transform_1, window_bounds = array<i64: 6, 1>}, {transform_indices = @transform_2, window_bounds = array<i64: 6, 256>}, {transform_indices = @transform_3, window_bounds = array<i64: 6, 256>}]} {
    %c0 = arith.constant 0 : index
    %c0_0 = arith.constant 0 : index
    %0 = vector.load %arg3[%c0, %c0_0] : memref<6x256xf32, #tpu.memory_space<vmem>>, vector<6x256xf32>
    %c0_1 = arith.constant 0 : index
    %c0_2 = arith.constant 0 : index
    %1 = vector.load %arg1[%c0_1, %c0_2] : memref<6x1xf32, #tpu.memory_space<vmem>>, vector<6x1xf32>
    %2 = vector.broadcast %1 : vector<6x1xf32> to vector<6x256xf32>
    %3 = arith.subf %0, %2 : vector<6x256xf32>
    %c0_3 = arith.constant 0 : index
    %c0_4 = arith.constant 0 : index
    %4 = vector.load %arg2[%c0_3, %c0_4] : memref<6x1xf32, #tpu.memory_space<vmem>>, vector<6x1xf32>
    %5 = vector.broadcast %4 : vector<6x1xf32> to vector<6x256xf32>
    %6 = arith.mulf %3, %5 : vector<6x256xf32>
    %c0_5 = arith.constant 0 : index
    %c0_6 = arith.constant 0 : index
    %7 = vector.load %arg4[%c0_5, %c0_6] : memref<6x256xf32, #tpu.memory_space<vmem>>, vector<6x256xf32>
    tpu.vector_store %arg4[%c0_5, %c0_6], %6 {strides = array<i32>} : memref<6x256xf32, #tpu.memory_space<vmem>>, vector<6x256xf32>,
    return
  }
  func.func @transform_0(%arg0: i32) -> (i32, i32) {
    %c0_i32 = arith.constant 0 : i32
    %c0_i32_0 = arith.constant 0 : i32
    return %arg0, %c0_i32 : i32, i32
  }
  func.func @transform_1(%arg0: i32) -> (i32, i32) {
    %c0_i32 = arith.constant 0 : i32
    %c0_i32_0 = arith.constant 0 : i32
    return %arg0, %c0_i32 : i32, i32
  }
  func.func @transform_2(%arg0: i32) -> (i32, i32) {
    %c0_i32 = arith.constant 0 : i32
    %c0_i32_0 = arith.constant 0 : i32
    return %arg0, %c0_i32 : i32, i32
  }
  func.func @transform_3(%arg0: i32) -> (i32, i32) {
    %c0_i32 = arith.constant 0 : i32
    %c0_i32_0 = arith.constant 0 : i32
    return %arg0, %c0_i32 : i32, i32
  }
}

</mosaic_0001>

<bundles_post_ra>
// kernel: tpu_custom_call.1
= control target key start
LH: loop header
LB: loop body
LE: loop exit
PB: predicated region body
PF: predicated region fallthrough
CT: control target
= control target key end

     0   :  { %v74_v1 = vmov 0   ;;  %s111_s0 = inlined_call_operand.vmem [shape: f32[6,1], index: 0, kind: input, shape index: {}]   ;;  %s112_s1 = inlined_call_operand.vmem [shape: f32[6,1], index: 1, kind: input, shape index: {}]   ;;  %s113_s2 = inlined_call_operand.vmem [shape: f32[6,256], index: 2, kind: input, shape index: {}]   ;;  %s114_s3 = inlined_call_operand.hbm [shape: f32[6,256], index: 3, kind: output, shape index: {}]  }
   0x1   :  { %v17_v0 = vld [vmem:[%s111_s0] sm:$0x3f]  ;;  %51 = vset.pattern.permute.xlu0 %v74_v1 }
   0x2   :  { %8 = vsyncpa [#allocation3], 0  ;;  %20 = vperm.xlu0 %51, %v17_v0   ;;  %v25_v2 = vld [vmem:[%s112_s1] sm:$0x3f]  ;;  %v16_v5 = vld [vmem:[%s113_s2 + $0x8] sm:$0x3f] }
   0x3   :  { %v15_v4 = vld [vmem:[%s113_s2] sm:$0x3f]  ;;  %s75_s20 = smov [#allocation2]  }
   0x4   :  { %s41_s0 = sshll.u32 %s75_s20, 4  ;;  %s42_s0 = int_to_ptr.vmem [resolvable:$true] %s41_s0 }
   0x5   :  { %s52_s1 = scalar_lea.vmem %s42_s0, 256  ;;  %p57_p1 = scmp.lt.s32.totalorder %s42_s0, %s42_s0 }
   0x6   :  { %28 = vperm.xlu0 %51, %v25_v2   ;;  %p53_p0 = scmp.ne.s32.totalorder %s42_s0, %s52_s1  ;;  %p58_p2 = scmp.lt.s32.totalorder %s52_s1, %s52_s1 }
   0x8   :  { %p59_p3 = por %p58_p2, %p57_p1 }
   0xa   :  { %p60_p4 = pnand %p59_p3, %p53_p0 }
  0x7d   :  { %v21_v3 = vpop.permute.xlu0 %20 }
  0x7e   :  { %v23_v6 = vsub.f32 %v15_v4, %v21_v3  ;;  %v24_v7 = vsub.f32 %v16_v5, %v21_v3 }
  0x81   :  { %v29_v8 = vpop.permute.xlu0 %28 }
  0x82   :  { %v31_v9 = vmul.f32 %v29_v8, %v23_v6  ;;  %v32_v10 = vmul.f32 %v29_v8, %v24_v7 }
  0x84   :  { %33 = vst [vmem:[#allocation2] sm:$0x3f] %v31_v9  ;;  %34 = vst [vmem:[#allocation2 + $0x8] sm:$0x3f] %v32_v10 }
  0x85   :  { %63 = shalt.err (!%p60_p4)
}
  0x86   :  { %44 = dma.vmem_to_hbm [thread:$0]  %s42_s0, 256, %s114_s3, [#allocation3]  }
  0x87   :  { %72 = dma.done.wait [#allocation3], 256  }
  0x88   :  { %73 = vsyncadd [#allocation3], 4294967040 }
  0x89   :  { %48 = vsyncpa [#allocation3], 1 }

</bundles_post_ra>
